<compile_context>
chip_gen: v6e
topology: v6e:2x2x1
jax: 0.10.0
libtpu: 0.0.40
codegen_flags: <defaults>
</compile_context>

<pallas_src>
import functools
import math

import jax
import jax.numpy as jnp
from jax.experimental import pallas as pl
from jax.experimental.pallas import tpu as pltpu

_LANE = 128
_SUBLANE = 8
_MIB = 1024 * 1024


def _vmem_budget():
    """Generation-aware (double-buffered block budget, vmem_limit) in bytes."""
    try:
        vmem = getattr(pltpu.get_tpu_info(), "vmem_capacity_bytes", None)
    except Exception:
        vmem = None
    if vmem is None:
        vmem = 64 * _MIB  # conservative default == v7x per-TensorCore VMEM
    if vmem <= 64 * _MIB:
        # v7x-class (64 MiB/TC): keep blocks + compiler scratch well under.
        return 24 * _MIB, 48 * _MIB
    # v5e / v6e (128 MiB/TC): bigger tiles cut the ~0.35 us/step overhead.
    return 40 * _MIB, 80 * _MIB


def _sum_kernel(n, weighted, *refs):
    """refs = ([w_smem,] x_0, ..., x_{n-1}, out)."""
    if weighted:
        w_ref = refs[0]
        x_refs = refs[1:1 + n]
        o_ref = refs[1 + n]
        acc = x_refs[0][...].astype(jnp.float32)
        for i in range(1, n):
            acc = acc + x_refs[i][...].astype(jnp.float32) * w_ref[i - 1]
        o_ref[...] = acc.astype(o_ref.dtype)
    else:
        x_refs = refs[:n]
        o_ref = refs[n]
        y = x_refs[0][...]
        for i in range(1, n):
            y = y + x_refs[i][...]
        o_ref[...] = y.astype(o_ref.dtype)


def _call(kernel, x2d, w_args, w_specs, block, grid, index_map, out_dtype,
          vmem_limit):
    n = len(x2d)
    spec = pl.BlockSpec(block, index_map)
    return pl.pallas_call(
        kernel,
        out_shape=jax.ShapeDtypeStruct(x2d[0].shape, out_dtype),
        grid=grid,
        in_specs=list(w_specs) + [spec] * n,
        out_specs=spec,
        compiler_params=pltpu.CompilerParams(
            dimension_semantics=("parallel",),
            vmem_limit_bytes=vmem_limit,
        ),
    )(*w_args, *x2d)


def pallas_sum(xs, w=None):
    """xs: list of n equal-shape arrays. w: (n-1,) float32 weights, or None."""
    n = len(xs)
    shape = xs[0].shape
    dtype = xs[0].dtype
    total = math.prod(shape) if shape else 1
    weighted = w is not None
    # torch promotes x * float32-Parameter -> float32 for sub-f32 inputs.
    out_dtype = jnp.promote_types(dtype, jnp.float32) if weighted else dtype

    block_budget, vmem_limit = _vmem_budget()
    itemsize = max(jnp.dtype(dtype).itemsize, jnp.dtype(out_dtype).itemsize)
    # Elements per block such that (n inputs + 1 output), each double-buffered,
    # stay within the per-generation budget.
    blk_elems = max(_LANE, block_budget // (2 * (n + 1) * itemsize))

    kernel = functools.partial(_sum_kernel, n, weighted)
    if weighted:
        w_args = (jnp.asarray(w, jnp.float32).reshape(n - 1),)
        w_specs = (pl.BlockSpec(memory_space=pltpu.MemorySpace.SMEM),)
    else:
        w_args, w_specs = (), ()

    if total % _LANE == 0:
        # ---- Aligned fast path: lane-dense 2-D slab. ----
        # Widest lane tile that still keeps >= 8 sublane rows; tiny tensors
        # just take the narrowest divisor (single full block).
        tl = _LANE
        for cand in (2048, 1024, 512, 256, 128):
            if total % cand == 0 and total // cand >= _SUBLANE:
                tl = cand
                break
        rows = total // tl
        x2d = [x.reshape(rows, tl) for x in xs]

        if rows <= _SUBLANE:
            tr = rows  # tiny input: one full block (full dims bypass (8,128))
        else:
            tr = min(max(1, blk_elems // tl), rows)
            tr = max(_SUBLANE, (tr // _SUBLANE) * _SUBLANE)
            if tr >= rows and rows >= 2 * _SUBLANE:
                # Force >= 2 grid steps so v7x can use both TensorCores.
                tr = ((rows + 2 * _SUBLANE - 1) // (2 * _SUBLANE)) * _SUBLANE
        out = _call(kernel, x2d, w_args, w_specs, (tr, tl),
                    (pl.cdiv(rows, tr),), lambda i: (i, 0), out_dtype,
                    vmem_limit)
        return out.reshape(shape)

    # ---- Non-128-multiple element count: never jnp.pad (extra HBM passes). ----
    if total <= blk_elems or len(shape) < 2:
        # One full-array block; block dims equal to the full array dims bypass
        # the (8,128) rule, so no padding or output-slice passes are needed.
        # TODO(synk): a huge 1-D non-128-multiple input should use a masked
        # tail tile instead of one monolithic block.
        x2d = [x.reshape(1, total) for x in xs]
        out = _call(kernel, x2d, w_args, w_specs, (1, total), (1,),
                    lambda i: (0, 0), out_dtype, vmem_limit)
        return out.reshape(shape)

    # Large & unaligned: collapse leading dims and block them, keeping the full
    # trailing extent (last block dim == array dim, so (8,128) is bypassed).
    ndim = len(shape)
    split = ndim - 1
    for k in range(1, ndim):
        if (total // math.prod(shape[:k])) * _SUBLANE <= blk_elems:
            split = k
            break
    lead = math.prod(shape[:split])
    rest = total // lead
    x2d = [x.reshape(lead, rest) for x in xs]
    tb = min(lead, max(_SUBLANE, ((blk_elems // rest) // _SUBLANE) * _SUBLANE))
    if tb < lead and tb % _SUBLANE:
        tb = lead  # safety: a partial leading block must be sublane-aligned
    out = _call(kernel, x2d, w_args, w_specs, (tb, rest),
                (pl.cdiv(lead, tb),), lambda i: (i, 0), out_dtype, vmem_limit)
    return out.reshape(shape)


def sum_module_forward(xs, n, weight=False):
    """Mirror of the PyTorch Sum.forward. xs: list of n equal-shape arrays."""
    if weight:
        # nn.Parameter init: w = -arange(1., n) / 2; forward uses sigmoid(w)*2.
        w_param = -jnp.arange(1.0, n, dtype=jnp.float32) / 2.0
        w = jax.nn.sigmoid(w_param) * 2.0
    else:
        w = None
    return pallas_sum(list(xs), w)


def reference_forward(xs, n, weight=False):
    y = xs[0]
    if weight:
        w_param = -jnp.arange(1.0, n, dtype=jnp.float32) / 2.0
        w = jax.nn.sigmoid(w_param) * 2.0
        for i in range(n - 1):
            y = y + xs[i + 1] * w[i]
    else:
        for i in range(n - 1):
            y = y + xs[i + 1]
    return y


if __name__ == "__main__":
    key = jax.random.PRNGKey(0)
    n = 3
    ok = True
    # Aligned single-block, aligned multi-block (grid >= 2 for v7x TC split),
    # and an awkward non-multiple-of-128 shape (exercises the no-pad path).
    for shape in [(2, 4, 16, 16), (4, 16, 32, 32), (3, 5, 7, 11)]:
        keys = jax.random.split(key, n)
        xs = [jax.random.normal(k, shape, dtype=jnp.float32) for k in keys]
        for weighted in (False, True):
            out = jax.block_until_ready(
                sum_module_forward(xs, n, weight=weighted))
            ref = reference_forward(xs, n, weight=weighted)
            if (out.shape != ref.shape or out.dtype != ref.dtype
                    or not jnp.allclose(out, ref, atol=1e-5, rtol=1e-5)):
                ok = False

    if ok:
        print("KERNEL_OK")
</pallas_src>

<mosaic_0001>
module attributes {stable_mosaic.version = 11 : i64} {
  func.func @_sum_kernel(%arg0: i32, %arg1: memref<8x256xf32, #tpu.memory_space<vmem>>, %arg2: memref<8x256xf32, #tpu.memory_space<vmem>>, %arg3: memref<8x256xf32, #tpu.memory_space<vmem>>, %arg4: memref<8x256xf32, #tpu.memory_space<vmem>>) attributes {dimension_semantics = [#tpu.dimension_semantics<parallel>], iteration_bounds = array<i64: 1>, scalar_prefetch = 0 : i64, scratch_operands = 0 : i64, tpu.core_type = #tpu.core_type<tc>, window_params = [{transform_indices = @transform_0, window_bounds = array<i64: 8, 256>}, {transform_indices = @transform_1, window_bounds = array<i64: 8, 256>}, {transform_indices = @transform_2, window_bounds = array<i64: 8, 256>}, {transform_indices = @transform_3, window_bounds = array<i64: 8, 256>}]} {
    %c0 = arith.constant 0 : index
    %c0_0 = arith.constant 0 : index
    %0 = vector.load %arg1[%c0, %c0_0] : memref<8x256xf32, #tpu.memory_space<vmem>>, vector<8x256xf32>
    %c0_1 = arith.constant 0 : index
    %c0_2 = arith.constant 0 : index
    %1 = vector.load %arg2[%c0_1, %c0_2] : memref<8x256xf32, #tpu.memory_space<vmem>>, vector<8x256xf32>
    %2 = arith.addf %0, %1 : vector<8x256xf32>
    %c0_3 = arith.constant 0 : index
    %c0_4 = arith.constant 0 : index
    %3 = vector.load %arg3[%c0_3, %c0_4] : memref<8x256xf32, #tpu.memory_space<vmem>>, vector<8x256xf32>
    %4 = arith.addf %2, %3 : vector<8x256xf32>
    %c0_5 = arith.constant 0 : index
    %c0_6 = arith.constant 0 : index
    %5 = vector.load %arg4[%c0_5, %c0_6] : memref<8x256xf32, #tpu.memory_space<vmem>>, vector<8x256xf32>
    tpu.vector_store %arg4[%c0_5, %c0_6], %4 {strides = array<i32>} : memref<8x256xf32, #tpu.memory_space<vmem>>, vector<8x256xf32>,
    return
  }
  func.func @transform_0(%arg0: i32) -> (i32, i32) {
    %c0_i32 = arith.constant 0 : i32
    %c0_i32_0 = arith.constant 0 : i32
    return %arg0, %c0_i32 : i32, i32
  }
  func.func @transform_1(%arg0: i32) -> (i32, i32) {
    %c0_i32 = arith.constant 0 : i32
    %c0_i32_0 = arith.constant 0 : i32
    return %arg0, %c0_i32 : i32, i32
  }
  func.func @transform_2(%arg0: i32) -> (i32, i32) {
    %c0_i32 = arith.constant 0 : i32
    %c0_i32_0 = arith.constant 0 : i32
    return %arg0, %c0_i32 : i32, i32
  }
  func.func @transform_3(%arg0: i32) -> (i32, i32) {
    %c0_i32 = arith.constant 0 : i32
    %c0_i32_0 = arith.constant 0 : i32
    return %arg0, %c0_i32 : i32, i32
  }
}

</mosaic_0001>

<bundles_post_ra>
// kernel: tpu_custom_call.1
= control target key start
LH: loop header
LB: loop body
LE: loop exit
PB: predicated region body
PF: predicated region fallthrough
CT: control target
= control target key end

     0   :  { %8 = vsyncpa [#allocation3], 0  ;;  %s204_s0 = inlined_call_operand.hbm [shape: f32[8,256], index: 0, kind: input, shape index: {}]   ;;  %s205_s1 = inlined_call_operand.hbm [shape: f32[8,256], index: 1, kind: input, shape index: {}]   ;;  %s206_s2 = inlined_call_operand.hbm [shape: f32[8,256], index: 2, kind: input, shape index: {}]   ;;  %s207_s3 = inlined_call_operand.hbm [shape: f32[8,256], index: 3, kind: output, shape index: {}]  }
   0x1   :  { %9 = vsyncpa [#allocation6], 0 }
   0x2   :  { %10 = vsyncpa [#allocation4], 0  ;;  %s168_s12 = smov [#allocation5]   ;;  %s169_s14 = smov [#allocation2]  }
   0x3   :  { %s27_s13 = sshll.u32 %s168_s12, 4  ;;  %s17_s15 = sshll.u32 %s169_s14, 4  ;;  %s28_s13 = int_to_ptr.vmem [resolvable:$true] %s27_s13  ;;  %s18_s15 = int_to_ptr.vmem [resolvable:$true] %s17_s15 }
   0x4   :  { %s90_s16 = scalar_lea.vmem %s28_s13, 256  ;;  %p95_p1 = scmp.lt.s32.totalorder %s28_s13, %s28_s13 }
   0x5   :  { %p91_p0 = scmp.ne.s32.totalorder %s28_s13, %s90_s16  ;;  %p96_p2 = scmp.lt.s32.totalorder %s90_s16, %s90_s16 }
   0x7   :  { %p97_p3 = por %p96_p2, %p95_p1 }
   0x9   :  { %p98_p4 = pnand %p97_p3, %p91_p0 }
   0xb   :  { %101 = shalt.err (!%p98_p4)
}
   0xc   :  { %30 = dma.hbm_to_vmem [thread:$0]  %s205_s1, 256, %s28_s13, [#allocation6]  }
   0xd   :  { %s110_s19 = scalar_lea.vmem %s18_s15, 256  ;;  %p115_p6 = scmp.lt.s32.totalorder %s18_s15, %s18_s15 }
   0xe   :  { %p111_p5 = scmp.ne.s32.totalorder %s18_s15, %s110_s19  ;;  %p116_p7 = scmp.lt.s32.totalorder %s110_s19, %s110_s19 }
  0x10   :  { %p117_p8 = por %p116_p7, %p115_p6 }
  0x12   :  { %p118_p9 = pnand %p117_p8, %p111_p5 }
  0x14   :  { %121 = shalt.err (!%p118_p9)
}
  0x15   :  { %20 = dma.hbm_to_vmem [thread:$0]  %s204_s0, 256, %s18_s15, [#allocation3]  }
  0x16   :  { %s170_s22 = smov [#allocation7]  }
  0x17   :  { %s37_s23 = sshll.u32 %s170_s22, 4  ;;  %s38_s23 = int_to_ptr.vmem [resolvable:$true] %s37_s23 }
  0x18   :  { %s130_s24 = scalar_lea.vmem %s38_s23, 256  ;;  %p135_p11 = scmp.lt.s32.totalorder %s38_s23, %s38_s23 }
  0x19   :  { %p131_p10 = scmp.ne.s32.totalorder %s38_s23, %s130_s24  ;;  %p136_p12 = scmp.lt.s32.totalorder %s130_s24, %s130_s24 }
  0x1b   :  { %p137_p13 = por %p136_p12, %p135_p11 }
  0x1d   :  { %p138_p0 = pnand %p137_p13, %p131_p10 }
  0x1f   :  { %141 = shalt.err (!%p138_p0)
}
  0x20   :  { %40 = dma.hbm_to_vmem [thread:$0]  %s206_s2, 256, %s38_s23, [#allocation6]  }
  0x21   :  { %162 = dma.done.wait [#allocation3], 256  }
  0x22   :  { %163 = vsyncadd [#allocation3], 4294967040 }
  0x23   :  { %164 = dma.done.wait [#allocation6], 512  }
  0x24   :  { %165 = vsyncadd [#allocation6], 4294966784  ;;  %v50_v0 = vld [vmem:[#allocation2] sm:$0xff]  ;;  %v52_v1 = vld [vmem:[#allocation5] sm:$0xff]  ;;  %s171_s0 = smov [#allocation8]  }
  0x25   :  { %v56_v2 = vld [vmem:[#allocation7] sm:$0xff]  ;;  %v54_v3 = vadd.f32 %v52_v1, %v50_v0  ;;  %v51_v4 = vld [vmem:[#allocation2 + $0x8] sm:$0xff]  ;;  %v53_v5 = vld [vmem:[#allocation5 + $0x8] sm:$0xff]  ;;  %s68_s26 = sshll.u32 %s171_s0, 4  ;;  %s69_s26 = int_to_ptr.vmem [resolvable:$true] %s68_s26 }
  0x26   :  { %v57_v6 = vld [vmem:[#allocation7 + $0x8] sm:$0xff]  ;;  %v55_v7 = vadd.f32 %v53_v5, %v51_v4  ;;  %s142_s2 = scalar_lea.vmem %s69_s26, 256  ;;  %p147_p2 = scmp.lt.s32.totalorder %s69_s26, %s69_s26 }
  0x27   :  { %v58_v8 = vadd.f32 %v56_v2, %v54_v3  ;;  %p143_p1 = scmp.ne.s32.totalorder %s69_s26, %s142_s2  ;;  %p148_p3 = scmp.lt.s32.totalorder %s142_s2, %s142_s2 }
  0x28   :  { %v59_v9 = vadd.f32 %v57_v6, %v55_v7 }
  0x29   :  { %60 = vst [vmem:[#allocation8] sm:$0xff] %v58_v8  ;;  %p149_p4 = por %p148_p3, %p147_p2 }
  0x2a   :  { %61 = vst [vmem:[#allocation8 + $0x8] sm:$0xff] %v59_v9 }
  0x2b   :  { %p150_p5 = pnand %p149_p4, %p143_p1 }
  0x2d   :  { %153 = shalt.err (!%p150_p5)
}
  0x2e   :  { %71 = dma.vmem_to_hbm [thread:$0]  %s69_s26, 256, %s207_s3, [#allocation4]  }
  0x2f   :  { %166 = dma.done.wait [#allocation4], 256  }
  0x30   :  { %167 = vsyncadd [#allocation4], 4294967040 }
  0x31   :  { %75 = vsyncpa [#allocation3], 1 }
  0x32   :  { %76 = vsyncpa [#allocation6], 1 }
  0x33   :  { %77 = vsyncpa [#allocation4], 1 }

</bundles_post_ra>
